<compile_context>
chip_gen: v7x
topology: tpu7x:2x2x1
jax: 0.10.0
libtpu: 0.0.40
codegen_flags: <defaults>
</compile_context>

<pallas_src>
import math

import jax
import jax.numpy as jnp
from jax.experimental import pallas as pl
from jax.experimental.pallas import tpu as pltpu


def harmonics(n: int) -> jnp.ndarray:
    # Registered as a parameter in the PyTorch module but never used by
    # Dct2DInverse.forward; kept for parity only.
    spatial = jnp.arange(float(n)).reshape((n, 1))
    spectral = jnp.arange(float(n)).reshape((1, n))
    spatial = 2.0 * spatial + 1.0
    spectral = spectral * math.pi / (2.0 * n)
    return jnp.cos(spatial @ spectral)


def normalize_matrix(n: int) -> jnp.ndarray:
    v = jnp.ones((n, 1), dtype=jnp.float32)
    v = v.at[0, 0].set(1.0 / math.sqrt(2.0))
    return v @ v.T


def _make_inverse_kernel(n: int):
    """Build the kernel over a (g, n*n) block of flattened, lane-dense images."""
    nn = n * n
    inv_sqrt2 = 1.0 / math.sqrt(2.0)
    scale = 1.0 / math.sqrt(2.0 * n)
    n_is_pow2 = (n & (n - 1)) == 0

    def kernel(coeff_ref, out_ref):
        # Rebuild the two rank-1 constant rows in-registers (cheap VPU work,
        # hidden under the tile DMA); avoids extra inputs / double buffers.
        idx = jax.lax.broadcasted_iota(jnp.int32, (1, nn), 1)
        row0 = idx < n                                  # j == 0  (and i == 0)
        if n_is_pow2:
            col0 = (idx & (n - 1)) == 0                 # k == 0  (and l == 0)
        else:
            col0 = (idx % n) == 0
        # w[j*n+k]     = v[j]^2 * v[k]^2        (v[0]^2 = 1/2, else 1)
        # plane[i*n+l] = scale * v[i] * v[l]    (v[0]   = 1/sqrt(2), else 1)
        w = jnp.where(row0, 0.5, 1.0) * jnp.where(col0, 0.5, 1.0)
        plane = scale * (jnp.where(row0, inv_sqrt2, 1.0)
                         * jnp.where(col0, inv_sqrt2, 1.0))

        c = coeff_ref[...]                              # (g, n*n)
        s = jnp.sum(c * w, axis=-1, keepdims=True)      # (g, 1) per-image scalar
        out_ref[...] = (s * plane).astype(out_ref.dtype)

    return kernel


def _choose_block_rows(total_rows: int, row_elems: int, itemsize: int) -> int:
    """Rows per grid step.

    Targets ~4 MiB of coefficients per step while guaranteeing at least two
    (preferably an even number of) grid steps whenever total_rows > 8, so the
    "parallel" batch axis can shard across both v7x TensorCores.  Keeps the
    sublane dim a multiple of 8 unless the block spans the whole array.
    """
    if total_rows <= 8:
        return total_rows              # full-array block: always layout-legal
    target = max(8, ((4 << 20) // max(1, row_elems * itemsize)) // 8 * 8)
    steps = max(2, -(-total_rows // target))
    if steps % 2:
        steps += 1                     # even step count -> balanced 2-TC split
    g = -(-total_rows // steps)
    return max(8, -(-g // 8) * 8)      # round up to a sublane multiple


def dct2d_inverse(coeff: jnp.ndarray, img_size: int) -> jnp.ndarray:
    """coeff: [B, C, N, N] float32 -> img: [B, C, N, N] float32."""
    B, C, N, N2 = coeff.shape
    assert N == img_size and N2 == img_size

    rows, cols = B * C, N * N
    coeff_flat = coeff.reshape((rows, cols))   # lane-dense (multiple-of-128) rows

    g = _choose_block_rows(rows, cols, coeff.dtype.itemsize)
    grid = (pl.cdiv(rows, g),)

    out_flat = pl.pallas_call(
        _make_inverse_kernel(N),
        out_shape=jax.ShapeDtypeStruct((rows, cols), coeff.dtype),
        grid_spec=pltpu.PrefetchScalarGridSpec(
            num_scalar_prefetch=0,
            grid=grid,
            in_specs=[pl.BlockSpec((g, cols), lambda i: (i, 0))],
            out_specs=pl.BlockSpec((g, cols), lambda i: (i, 0)),
        ),
        compiler_params=pltpu.CompilerParams(
            dimension_semantics=("parallel",),
            # Explicit scoped-VMEM budget: 2 x (in tile + out tile) double
            # buffers (~16 MiB worst case) must also fit on v5e (16 MiB default).
            vmem_limit_bytes=32 * 1024 * 1024,
        ),
        cost_estimate=pl.CostEstimate(
            flops=3 * rows * cols,               # mul + reduce-add + scale-mul
            transcendentals=0,
            bytes_accessed=2 * rows * cols * coeff.dtype.itemsize,
        ),
    )(coeff_flat)

    return out_flat.reshape((B, C, N, N))


def _reference(coeff: jnp.ndarray, img_size: int) -> jnp.ndarray:
    scale = 1.0 / math.sqrt(2.0 * img_size)
    nm = normalize_matrix(img_size).astype(jnp.float32)
    # Same as torch: Nm @ (Nm * coeff) @ Nm.T (batched over B, C).
    return scale * jnp.einsum("ij,bcjk,lk->bcil", nm, nm * coeff, nm)


if __name__ == "__main__":
    B, C, N = 2, 4, 16
    key = jax.random.PRNGKey(0)
    x = jax.random.normal(key, (B, C, N, N), dtype=jnp.float32)

    out = dct2d_inverse(x, img_size=N)
    out = jax.block_until_ready(out)

    ref = _reference(x, img_size=N)
    assert out.shape == (B, C, N, N)
    assert jnp.allclose(out, ref, atol=1e-5, rtol=1e-5)

    print("KERNEL_OK")
</pallas_src>

<mosaic_0001>
module attributes {stable_mosaic.version = 11 : i64} {
  func.func @kernel(%arg0: i32, %arg1: memref<8x256xf32, #tpu.memory_space<vmem>>, %arg2: memref<8x256xf32, #tpu.memory_space<vmem>>) attributes {dimension_semantics = [#tpu.dimension_semantics<parallel>], iteration_bounds = array<i64: 1>, scalar_prefetch = 0 : i64, scratch_operands = 0 : i64, tpu.core_type = #tpu.core_type<tc>, window_params = [{transform_indices = @transform_0, window_bounds = array<i64: 8, 256>}, {transform_indices = @transform_1, window_bounds = array<i64: 8, 256>}]} {
    %0 = tpu.iota {dimensions = array<i32: 1>} : vector<1x256xi32>
    %c16_i32 = arith.constant 16 : i32
    %1 = vector.broadcast %c16_i32 : i32 to vector<1x256xi32>
    %2 = arith.cmpi slt, %0, %1 : vector<1x256xi32>
    %c15_i32 = arith.constant 15 : i32
    %3 = vector.broadcast %c15_i32 : i32 to vector<1x256xi32>
    %4 = arith.andi %0, %3 : vector<1x256xi32>
    %c0_i32 = arith.constant 0 : i32
    %5 = vector.broadcast %c0_i32 : i32 to vector<1x256xi32>
    %6 = arith.cmpi eq, %4, %5 : vector<1x256xi32>
    %cst = arith.constant 5.000000e-01 : f32
    %cst_0 = arith.constant 1.000000e+00 : f32
    %7 = vector.broadcast %cst : f32 to vector<1x256xf32>
    %8 = vector.broadcast %cst_0 : f32 to vector<1x256xf32>
    %9 = arith.select %2, %7, %8 : vector<1x256xi1>, vector<1x256xf32>
    %cst_1 = arith.constant 5.000000e-01 : f32
    %cst_2 = arith.constant 1.000000e+00 : f32
    %10 = vector.broadcast %cst_1 : f32 to vector<1x256xf32>
    %11 = vector.broadcast %cst_2 : f32 to vector<1x256xf32>
    %12 = arith.select %6, %10, %11 : vector<1x256xi1>, vector<1x256xf32>
    %13 = arith.mulf %9, %12 : vector<1x256xf32>
    %cst_3 = arith.constant 0.707106769 : f32
    %cst_4 = arith.constant 1.000000e+00 : f32
    %14 = vector.broadcast %cst_3 : f32 to vector<1x256xf32>
    %15 = vector.broadcast %cst_4 : f32 to vector<1x256xf32>
    %16 = arith.select %2, %14, %15 : vector<1x256xi1>, vector<1x256xf32>
    %cst_5 = arith.constant 0.707106769 : f32
    %cst_6 = arith.constant 1.000000e+00 : f32
    %17 = vector.broadcast %cst_5 : f32 to vector<1x256xf32>
    %18 = vector.broadcast %cst_6 : f32 to vector<1x256xf32>
    %19 = arith.select %6, %17, %18 : vector<1x256xi1>, vector<1x256xf32>
    %20 = arith.mulf %16, %19 : vector<1x256xf32>
    %cst_7 = arith.constant 0.176776692 : f32
    %21 = vector.broadcast %cst_7 : f32 to vector<1x256xf32>
    %22 = arith.mulf %21, %20 : vector<1x256xf32>
    %c0 = arith.constant 0 : index
    %c0_8 = arith.constant 0 : index
    %23 = vector.load %arg1[%c0, %c0_8] : memref<8x256xf32, #tpu.memory_space<vmem>>, vector<8x256xf32>
    %24 = vector.broadcast %13 : vector<1x256xf32> to vector<8x256xf32>
    %25 = arith.mulf %23, %24 : vector<8x256xf32>
    %cst_9 = arith.constant dense<0.000000e+00> : vector<8xf32>
    %26 = vector.multi_reduction <add>, %25, %cst_9 [1] : vector<8x256xf32> to vector<8xf32>
    %27 = vector.shape_cast %26 : vector<8xf32> to vector<8x1xf32>
    %28 = vector.broadcast %27 : vector<8x1xf32> to vector<8x256xf32>
    %29 = vector.broadcast %22 : vector<1x256xf32> to vector<8x256xf32>
    %30 = arith.mulf %28, %29 : vector<8x256xf32>
    %c0_10 = arith.constant 0 : index
    %c0_11 = arith.constant 0 : index
    %31 = vector.load %arg2[%c0_10, %c0_11] : memref<8x256xf32, #tpu.memory_space<vmem>>, vector<8x256xf32>
    tpu.vector_store %arg2[%c0_10, %c0_11], %30 {strides = array<i32>} : memref<8x256xf32, #tpu.memory_space<vmem>>, vector<8x256xf32>,
    return
  }
  func.func @transform_0(%arg0: i32) -> (i32, i32) {
    %c0_i32 = arith.constant 0 : i32
    %c0_i32_0 = arith.constant 0 : i32
    return %arg0, %c0_i32 : i32, i32
  }
  func.func @transform_1(%arg0: i32) -> (i32, i32) {
    %c0_i32 = arith.constant 0 : i32
    %c0_i32_0 = arith.constant 0 : i32
    return %arg0, %c0_i32 : i32, i32
  }
}

</mosaic_0001>

<bundles_post_ra>
// kernel: tpu_custom_call.1
= control target key start
LH: loop header
LB: loop body
LE: loop exit
PB: predicated region body
PF: predicated region fallthrough
CT: control target
= control target key end

     0   :  { %6 = vsyncpa [#allocation3], 0  ;;  %s158_s0 = inlined_call_operand.hbm [shape: f32[8,256], index: 0, kind: input, shape index: {}]   ;;  %s159_s1 = inlined_call_operand.hbm [shape: f32[8,256], index: 1, kind: output, shape index: {}]  }
   0x1   :  { %7 = vsyncpa [#allocation4], 0  ;;  %s121_s6 = smov [#allocation2]   ;;  %s73_s10 = scalar_lea.hbm %s158_s0, 256 }
   0x2   :  { %s14_s7 = sshll.u32 %s121_s6, 4  ;;  %p74_p0 = scmp.ne.s32.totalorder %s158_s0, %s73_s10  ;;  %s15_s7 = int_to_ptr.vmem [resolvable:$true] %s14_s7 }
   0x3   :  { %p77_p1 = scmp.lt.u32.totalorder %s73_s10, %s158_s0 }
   0x5   :  { %p79_p2 = pnand %p77_p1, %p74_p0 }
   0x7   :  { %82 = shalt.err (!%p79_p2)
}
   0x8   :  { %s83_s15 = scalar_lea.vmem %s15_s7, 256  ;;  %p88_p4 = scmp.lt.s32.totalorder %s15_s7, %s15_s7 }
   0x9   :  { %p84_p3 = scmp.ne.s32.totalorder %s15_s7, %s83_s15  ;;  %p89_p5 = scmp.lt.s32.totalorder %s83_s15, %s83_s15 }
   0xb   :  { %p90_p6 = por %p89_p5, %p88_p4 }
   0xd   :  { %p91_p7 = pnand %p90_p6, %p84_p3 }
   0xf   :  { %94 = shalt.err (!%p91_p7)
}
  0x10   :  { %17 = dma.hbm_to_vmem [thread:$0]  %s158_s0, 256, %s15_s7, [#allocation3]  }
  0x11   :  { %117 = dma.done.wait [#allocation3], 256  }
  0x12   :  { %118 = vsyncadd [#allocation3], 4294967040  ;;  %v21_v0 = vlaneseq  ;;  %v122_v4 = vmov 1.0   ;;  %v44_v9 = vld [vmem:[#allocation2] sm:$0xff]  ;;  %v45_v10 = vld [vmem:[#allocation2 + $0x8] sm:$0xff]  ;;  %s123_s0 = smov [#allocation5]  }
  0x13   :  { %s61_s18 = sshll.u32 %s123_s0, 4  ;;  %s62_s18 = int_to_ptr.vmem [resolvable:$true] %s61_s18 }
  0x14   :  { %v22_v1 = vand.u32 127, %v21_v0  ;;  %s95_s19 = scalar_lea.vmem %s62_s18, 256  ;;  %p100_p9 = scmp.lt.s32.totalorder %s62_s18, %s62_s18 }
  0x15   :  { %p96_p8 = scmp.ne.s32.totalorder %s62_s18, %s95_s19  ;;  %p101_p10 = scmp.lt.s32.totalorder %s95_s19, %s95_s19 }
  0x16   :  { %v23_v2 = vadd.s32 128, %v22_v1  ;;  %vm24_vm0 = vcmp.lt.s32.totalorder %v22_v1, 16  ;;  %v26_v3 = vand.u32 15, %v22_v1 }
  0x17   :  { %v30_v5 = vsel %vm24_vm0, 0.5, %v122_v4  ;;  %v36_v6 = vsel %vm24_vm0, 0.70710677, %v122_v4  ;;  %p102_p11 = por %p101_p10, %p100_p9 }
  0x18   :  { %v27_v7 = vand.u32 15, %v23_v2  ;;  %vm28_vm1 = vcmp.eq.s32.totalorder %v26_v3, 0 }
  0x19   :  { %v32_v8 = vsel %vm28_vm1, 0.5, %v122_v4  ;;  %v38_v11 = vsel %vm28_vm1, 0.70710677, %v122_v4  ;;  %p103_p12 = pnand %p102_p11, %p96_p8 }
  0x1a   :  { %vm29_vm2 = vcmp.eq.s32.totalorder %v27_v7, 0  ;;  %v34_v12 = vmul.f32 %v32_v8, %v30_v5  ;;  %v40_v13 = vmul.f32 %v38_v11, %v36_v6 }
  0x1b   :  { %v33_v14 = vsel %vm29_vm2, 0.5, %v122_v4  ;;  %v39_v15 = vsel %vm29_vm2, 0.70710677, %v122_v4 }
  0x1c   :  { %v46_v16 = vmul.f32 %v44_v9, %v34_v12  ;;  %v47_v17 = vmul.f32 %v45_v10, %v33_v14  ;;  %v42_v19 = vmul.f32 0.17677669, %v40_v13  ;;  %v43_v20 = vmul.f32 0.17677669, %v39_v15 }
  0x1e   :  { %v48_v18 = vadd.f32 %v47_v17, %v46_v16 }
  0x20   :  { %49 = vadd.xlane.f32.xlu0 %v48_v18 }
  0xad   :  { %v50_v21 = vpop.xlane.xlu0 %49 }
  0xae   :  { %v51_v22 = vmul.f32 %v50_v21, %v42_v19  ;;  %v52_v23 = vmul.f32 %v50_v21, %v43_v20 }
  0xb0   :  { %53 = vst [vmem:[#allocation5] sm:$0xff] %v51_v22  ;;  %54 = vst [vmem:[#allocation5 + $0x8] sm:$0xff] %v52_v23 }
  0xb1   :  { %106 = shalt.err (!%p103_p12)
}
  0xb2   :  { %s107_s22 = scalar_lea.hbm %s159_s1, 256 }
  0xb3   :  { %p108_p13 = scmp.ne.s32.totalorder %s159_s1, %s107_s22  ;;  %p111_p0 = scmp.lt.u32.totalorder %s107_s22, %s159_s1 }
  0xb5   :  { %p113_p1 = pnand %p111_p0, %p108_p13 }
  0xb7   :  { %116 = shalt.err (!%p113_p1)
}
  0xb8   :  { %64 = dma.vmem_to_hbm [thread:$0]  %s62_s18, 256, %s159_s1, [#allocation4]  }
  0xb9   :  { %119 = dma.done.wait [#allocation4], 256  }
  0xba   :  { %120 = vsyncadd [#allocation4], 4294967040 }
  0xbb   :  { %68 = vsyncpa [#allocation3], 1 }
  0xbc   :  { %69 = vsyncpa [#allocation4], 1 }

</bundles_post_ra>
